<compile_context>
chip_gen: v5e
topology: v5e:2x2
jax: 0.10.0
libtpu: 0.0.40
codegen_flags: <defaults>
</compile_context>

<pallas_src>
import functools

import jax
import jax.numpy as jnp
import numpy as np
from jax.experimental import pallas as pl
from jax.experimental.pallas import tpu as pltpu


def _attn_kernel(xg_ref, wg_ref, wog_ref, o_ref, *, B, S, nh, dh_k, dh_v):
    """Fused multi-head causal self-attention, all (batch, head) groups at once.

    xg_ref  : (G, S, H)            input, replicated per head (g = h*B + b)
    wg_ref  : (G, H, 2*dh_k+dh_v)  per-head fused [Wq*scale | Wk | Wv]
    wog_ref : (G, dh_v, H)         per-head output projection rows of Wo
    o_ref   : (B, S, H)            output
    """
    G = nh * B

    # Fused QKV projection for every (head, batch) group: one batched MXU op.
    qkv = jax.lax.dot_general(
        xg_ref[...], wg_ref[...],
        dimension_numbers=(((2,), (1,)), ((0,), (0,))),
        preferred_element_type=jnp.float32)              # (G, S, 2*dh_k+dh_v)

    q = qkv[:, :, :dh_k]                                 # scale folded into Wq
    k = qkv[:, :, dh_k:2 * dh_k]
    v = qkv[:, :, 2 * dh_k:2 * dh_k + dh_v]

    # Causal bias built in-kernel: bias[., q, k] = -1e9 if k > q else 0.
    row = jax.lax.broadcasted_iota(jnp.int32, (G, S, S), 1)   # query index
    col = jax.lax.broadcasted_iota(jnp.int32, (G, S, S), 2)   # key index
    bias = jnp.where(col > row, jnp.float32(-1e9), jnp.float32(0.0))

    # logits[g, qi, ki] = sum_d q[g, qi, d] * k[g, ki, d]  (single batched op)
    logits = jax.lax.dot_general(
        q, k, dimension_numbers=(((2,), (2,)), ((0,), (0,))),
        preferred_element_type=jnp.float32) + bias       # (G, S, S)

    # One softmax chain over the stacked logits.
    logits = logits - jnp.max(logits, axis=-1, keepdims=True)
    p = jnp.exp(logits)
    w = p * pl.reciprocal(jnp.sum(p, axis=-1, keepdims=True), approx=True)

    # Context: (G, S, S) @ (G, S, dh_v) -> (G, S, dh_v), single batched op.
    ctx = jax.lax.dot_general(
        w, v, dimension_numbers=(((2,), (1,)), ((0,), (0,))),
        preferred_element_type=jnp.float32)

    # Head-batched output projection: (G, S, dh_v) @ (G, dh_v, H) -> (G, S, H).
    out_g = jax.lax.dot_general(
        ctx, wog_ref[...], dimension_numbers=(((2,), (1,)), ((0,), (0,))),
        preferred_element_type=jnp.float32)

    # Sum head contributions (g = h*B + b): identical to concat(ctx_h) @ Wo.
    # Static leading-dim slices + (nh-1) full-block VPU adds.
    out = out_g[0:B]
    for h in range(1, nh):
        out = out + out_g[h * B:(h + 1) * B]             # (B, S, H)

    # Single full-slab store.
    o_ref[...] = out.astype(o_ref.dtype)


def prepare_attn_params(wq, wk, wv, wo, *, num_heads):
    """One-time parameter prep: per-head weight stacking + scale fold.

    wq, wk: (H, kd), wv: (H, vd), wo: (vd, H)   -- [in, out] layout.
    Returns:
      w_head : (nh, H, 2*dh_k + dh_v)  = per-head [Wq*dh_k^-0.5 | Wk | Wv]
      wo_head: (nh, dh_v, H)           = per-head rows of Wo (head-major in vd)
    """
    H, kd = wq.shape
    vd = wv.shape[1]
    dh_k = kd // num_heads
    dh_v = vd // num_heads
    scale = jnp.float32(dh_k ** (-0.5))

    wq_h = (wq * scale).reshape(H, num_heads, dh_k).transpose(1, 0, 2)
    wk_h = wk.reshape(H, num_heads, dh_k).transpose(1, 0, 2)
    wv_h = wv.reshape(H, num_heads, dh_v).transpose(1, 0, 2)
    w_head = jnp.concatenate([wq_h, wk_h, wv_h], axis=2)   # (nh, H, 2dk+dv)
    wo_head = wo.reshape(num_heads, dh_v, H)                # (nh, dh_v, H)
    return w_head, wo_head


def attn_forward(x, w_head, wo_head):
    """x: [B, S, H] float32; w_head/wo_head from prepare_attn_params."""
    B, S, H = x.shape
    nh = w_head.shape[0]
    wc = w_head.shape[2]
    dh_v = wo_head.shape[1]
    dh_k = (wc - dh_v) // 2
    G = nh * B

    # Cheap replication onto the group axis (g = h*B + b); a few KiB of HBM
    # traffic that buys a single-batch-dim formulation for every dot_general.
    x_g = jnp.broadcast_to(x[None], (nh, B, S, H)).reshape(G, S, H)
    w_g = jnp.broadcast_to(w_head[:, None], (nh, B, H, wc)).reshape(G, H, wc)
    wo_g = jnp.broadcast_to(wo_head[:, None], (nh, B, dh_v, H)).reshape(G, dh_v, H)

    kernel = functools.partial(_attn_kernel, B=B, S=S, nh=nh,
                               dh_k=dh_k, dh_v=dh_v)

    return pl.pallas_call(
        kernel,
        out_shape=jax.ShapeDtypeStruct((B, S, H), x.dtype),
        grid_spec=pltpu.PrefetchScalarGridSpec(
            num_scalar_prefetch=0,
            grid=(1,),                                   # batch+head folded in
            in_specs=[
                pl.BlockSpec((G, S, H), lambda i: (0, 0, 0)),        # x_g
                pl.BlockSpec((G, H, wc), lambda i: (0, 0, 0)),       # w_g
                pl.BlockSpec((G, dh_v, H), lambda i: (0, 0, 0)),     # wo_g
            ],
            out_specs=pl.BlockSpec((B, S, H), lambda i: (0, 0, 0)),
        ),
        compiler_params=pltpu.CompilerParams(
            dimension_semantics=("arbitrary",)),
    )(x_g, w_g, wo_g)


def _reference(x, wq, wk, wv, wo, *, num_heads):
    """Pure-JAX replica of the PyTorch forward (global attention branch)."""
    B, S, H = x.shape
    kd, vd = wq.shape[1], wv.shape[1]
    dh_k, dh_v = kd // num_heads, vd // num_heads
    hp = dict(precision=jax.lax.Precision.HIGHEST)

    q = jnp.einsum('bsh,hk->bsk', x, wq, **hp)
    k = jnp.einsum('bsh,hk->bsk', x, wk, **hp)
    v = jnp.einsum('bsh,hk->bsk', x, wv, **hp)
    q = q.reshape(B, S, num_heads, dh_k).transpose(0, 2, 1, 3) * dh_k ** -0.5
    k = k.reshape(B, S, num_heads, dh_k).transpose(0, 2, 1, 3)
    v = v.reshape(B, S, num_heads, dh_v).transpose(0, 2, 1, 3)

    bias = -1e9 * jnp.triu(jnp.ones((S, S), jnp.float32), 1)
    logits = jnp.einsum('bnkd,bnqd->bnqk', k, q, **hp) + bias
    weights = jax.nn.softmax(logits, axis=-1)
    ctx = jnp.einsum('bnqk,bnkd->bnqd', weights, v, **hp)
    ctx = ctx.transpose(0, 2, 1, 3).reshape(B, S, vd)
    return jnp.einsum('bsv,vh->bsh', ctx, wo, **hp)


if __name__ == "__main__":
    # Small synthetic config consistent with the module.
    B, S, H = 2, 8, 32
    num_heads = 4
    kd, vd = 32, 32

    key = jax.random.PRNGKey(0)
    kx, kq, kk, kv, ko = jax.random.split(key, 5)
    x = jax.random.normal(kx, (B, S, H), dtype=jnp.float32)
    # Deterministic weights ([in, out] layout == torch Linear weight.T).
    wq = jax.random.normal(kq, (H, kd), dtype=jnp.float32) * 0.1
    wk = jax.random.normal(kk, (H, kd), dtype=jnp.float32) * 0.1
    wv = jax.random.normal(kv, (H, vd), dtype=jnp.float32) * 0.1
    wo = jax.random.normal(ko, (vd, H), dtype=jnp.float32) * 0.1

    # One-time parameter prep (fused per-head weights, scale folded into Wq).
    w_head, wo_head = prepare_attn_params(wq, wk, wv, wo, num_heads=num_heads)

    attn_fn = jax.jit(attn_forward)
    out = attn_fn(x, w_head, wo_head)
    out = jax.block_until_ready(out)

    ref = _reference(x, wq, wk, wv, wo, num_heads=num_heads)
    # Relaxed tolerance documented sources: pl.reciprocal(approx=True) on the
    # softmax denominator (EUP approx) and default MXU f32 precision vs. the
    # Precision.HIGHEST reference.  Forward/inference only.
    np.testing.assert_allclose(np.asarray(out), np.asarray(ref),
                               rtol=2e-3, atol=2e-3)
    print("KERNEL_OK")
</pallas_src>

<mosaic_0001>
module attributes {stable_mosaic.version = 11 : i64} {
  func.func @_attn_kernel(%arg0: i32, %arg1: memref<8x8x32xf32, #tpu.memory_space<vmem>>, %arg2: memref<8x32x24xf32, #tpu.memory_space<vmem>>, %arg3: memref<8x8x32xf32, #tpu.memory_space<vmem>>, %arg4: memref<2x8x32xf32, #tpu.memory_space<vmem>>) attributes {dimension_semantics = [#tpu.dimension_semantics<arbitrary>], iteration_bounds = array<i64: 1>, scalar_prefetch = 0 : i64, scratch_operands = 0 : i64, tpu.core_type = #tpu.core_type<tc>, window_params = [{pipeline_mode = #tpu.pipeline_mode<synchronous>, transform_indices = @transform_0, window_bounds = array<i64: 8, 8, 32>}, {pipeline_mode = #tpu.pipeline_mode<synchronous>, transform_indices = @transform_1, window_bounds = array<i64: 8, 32, 24>}, {pipeline_mode = #tpu.pipeline_mode<synchronous>, transform_indices = @transform_2, window_bounds = array<i64: 8, 8, 32>}, {pipeline_mode = #tpu.pipeline_mode<synchronous>, transform_indices = @transform_3, window_bounds = array<i64: 2, 8, 32>}]} {
    %c0 = arith.constant 0 : index
    %c0_0 = arith.constant 0 : index
    %c0_1 = arith.constant 0 : index
    %0 = vector.load %arg1[%c0, %c0_0, %c0_1] : memref<8x8x32xf32, #tpu.memory_space<vmem>>, vector<8x8x32xf32>
    %c0_2 = arith.constant 0 : index
    %c0_3 = arith.constant 0 : index
    %c0_4 = arith.constant 0 : index
    %1 = vector.load %arg2[%c0_2, %c0_3, %c0_4] : memref<8x32x24xf32, #tpu.memory_space<vmem>>, vector<8x32x24xf32>
    %cst = arith.constant dense<0.000000e+00> : vector<8x8x24xf32>
    %2 = tpu.matmul %0, %1, %cst {dimension_numbers = #tpu.dot_dimension_numbers<[2], [1], [1], [2], [0, 0, 0, 1, 1, 2], [0], [0]>} : vector<8x8x32xf32>, vector<8x32x24xf32>, vector<8x8x24xf32> -> vector<8x8x24xf32>
    %3 = vector.extract_strided_slice %2 {offsets = [0, 0, 0], sizes = [8, 8, 8], strides = [1, 1, 1]} : vector<8x8x24xf32> to vector<8x8x8xf32>
    %4 = vector.extract_strided_slice %2 {offsets = [0, 0, 8], sizes = [8, 8, 8], strides = [1, 1, 1]} : vector<8x8x24xf32> to vector<8x8x8xf32>
    %5 = vector.extract_strided_slice %2 {offsets = [0, 0, 16], sizes = [8, 8, 8], strides = [1, 1, 1]} : vector<8x8x24xf32> to vector<8x8x8xf32>
    %6 = tpu.iota {dimensions = array<i32: 1>} : vector<8x8x8xi32>
    %7 = tpu.iota {dimensions = array<i32: 2>} : vector<8x8x8xi32>
    %8 = arith.cmpi sgt, %7, %6 : vector<8x8x8xi32>
    %cst_5 = arith.constant -1.000000e+09 : f32
    %cst_6 = arith.constant 0.000000e+00 : f32
    %9 = vector.broadcast %cst_5 : f32 to vector<8x8x8xf32>
    %10 = vector.broadcast %cst_6 : f32 to vector<8x8x8xf32>
    %11 = arith.select %8, %9, %10 : vector<8x8x8xi1>, vector<8x8x8xf32>
    %cst_7 = arith.constant dense<0.000000e+00> : vector<8x8x8xf32>
    %12 = tpu.matmul %3, %4, %cst_7 {dimension_numbers = #tpu.dot_dimension_numbers<[2], [2], [1], [1], [0, 0, 0, 1, 1, 1], [0], [0]>} : vector<8x8x8xf32>, vector<8x8x8xf32>, vector<8x8x8xf32> -> vector<8x8x8xf32>
    %13 = arith.addf %12, %11 : vector<8x8x8xf32>
    %cst_8 = arith.constant dense<0xFF800000> : vector<8x8xf32>
    %14 = vector.multi_reduction <maximumf>, %13, %cst_8 [2] : vector<8x8x8xf32> to vector<8x8xf32>
    %15 = vector.shape_cast %14 : vector<8x8xf32> to vector<8x8x1xf32>
    %16 = vector.broadcast %15 : vector<8x8x1xf32> to vector<8x8x8xf32>
    %17 = arith.subf %13, %16 : vector<8x8x8xf32>
    %18 = math.exp %17 : vector<8x8x8xf32>
    %cst_9 = arith.constant dense<0.000000e+00> : vector<8x8xf32>
    %19 = vector.multi_reduction <add>, %18, %cst_9 [2] : vector<8x8x8xf32> to vector<8x8xf32>
    %20 = vector.shape_cast %19 : vector<8x8xf32> to vector<8x8x1xf32>
    %21 = tpu.reciprocal %20 {approx = true} : vector<8x8x1xf32> -> vector<8x8x1xf32>
    %22 = vector.broadcast %21 : vector<8x8x1xf32> to vector<8x8x8xf32>
    %23 = arith.mulf %18, %22 : vector<8x8x8xf32>
    %cst_10 = arith.constant dense<0.000000e+00> : vector<8x8x8xf32>
    %24 = tpu.matmul %23, %5, %cst_10 {dimension_numbers = #tpu.dot_dimension_numbers<[2], [1], [1], [2], [0, 0, 0, 1, 1, 2], [0], [0]>} : vector<8x8x8xf32>, vector<8x8x8xf32>, vector<8x8x8xf32> -> vector<8x8x8xf32>
    %c0_11 = arith.constant 0 : index
    %c0_12 = arith.constant 0 : index
    %c0_13 = arith.constant 0 : index
    %25 = vector.load %arg3[%c0_11, %c0_12, %c0_13] : memref<8x8x32xf32, #tpu.memory_space<vmem>>, vector<8x8x32xf32>
    %cst_14 = arith.constant dense<0.000000e+00> : vector<8x8x32xf32>
    %26 = tpu.matmul %24, %25, %cst_14 {dimension_numbers = #tpu.dot_dimension_numbers<[2], [1], [1], [2], [0, 0, 0, 1, 1, 2], [0], [0]>} : vector<8x8x8xf32>, vector<8x8x32xf32>, vector<8x8x32xf32> -> vector<8x8x32xf32>
    %27 = vector.extract_strided_slice %26 {offsets = [0, 0, 0], sizes = [2, 8, 32], strides = [1, 1, 1]} : vector<8x8x32xf32> to vector<2x8x32xf32>
    %28 = vector.extract_strided_slice %26 {offsets = [2, 0, 0], sizes = [2, 8, 32], strides = [1, 1, 1]} : vector<8x8x32xf32> to vector<2x8x32xf32>
    %29 = arith.addf %27, %28 : vector<2x8x32xf32>
    %30 = vector.extract_strided_slice %26 {offsets = [4, 0, 0], sizes = [2, 8, 32], strides = [1, 1, 1]} : vector<8x8x32xf32> to vector<2x8x32xf32>
    %31 = arith.addf %29, %30 : vector<2x8x32xf32>
    %32 = vector.extract_strided_slice %26 {offsets = [6, 0, 0], sizes = [2, 8, 32], strides = [1, 1, 1]} : vector<8x8x32xf32> to vector<2x8x32xf32>
    %33 = arith.addf %31, %32 : vector<2x8x32xf32>
    %c0_15 = arith.constant 0 : index
    %c0_16 = arith.constant 0 : index
    %c0_17 = arith.constant 0 : index
    %34 = vector.load %arg4[%c0_15, %c0_16, %c0_17] : memref<2x8x32xf32, #tpu.memory_space<vmem>>, vector<2x8x32xf32>
    tpu.vector_store %arg4[%c0_15, %c0_16, %c0_17], %33 {strides = array<i32>} : memref<2x8x32xf32, #tpu.memory_space<vmem>>, vector<2x8x32xf32>,
    return
  }
  func.func @transform_0(%arg0: i32) -> (i32, i32, i32) {
    %c0_i32 = arith.constant 0 : i32
    %c0_i32_0 = arith.constant 0 : i32
    %c0_i32_1 = arith.constant 0 : i32
    %c0_i32_2 = arith.constant 0 : i32
    return %c0_i32, %c0_i32_0, %c0_i32_1 : i32, i32, i32
  }
  func.func @transform_1(%arg0: i32) -> (i32, i32, i32) {
    %c0_i32 = arith.constant 0 : i32
    %c0_i32_0 = arith.constant 0 : i32
    %c0_i32_1 = arith.constant 0 : i32
    %c0_i32_2 = arith.constant 0 : i32
    return %c0_i32, %c0_i32_0, %c0_i32_1 : i32, i32, i32
  }
  func.func @transform_2(%arg0: i32) -> (i32, i32, i32) {
    %c0_i32 = arith.constant 0 : i32
    %c0_i32_0 = arith.constant 0 : i32
    %c0_i32_1 = arith.constant 0 : i32
    %c0_i32_2 = arith.constant 0 : i32
    return %c0_i32, %c0_i32_0, %c0_i32_1 : i32, i32, i32
  }
  func.func @transform_3(%arg0: i32) -> (i32, i32, i32) {
    %c0_i32 = arith.constant 0 : i32
    %c0_i32_0 = arith.constant 0 : i32
    %c0_i32_1 = arith.constant 0 : i32
    %c0_i32_2 = arith.constant 0 : i32
    return %c0_i32, %c0_i32_0, %c0_i32_1 : i32, i32, i32
  }
}

</mosaic_0001>

<bundles_post_ra>
// kernel: attn_forward.1
= control target key start
LH: loop header
LB: loop body
LE: loop exit
PB: predicated region body
PF: predicated region fallthrough
CT: control target
= control target key end

     0   :  { %vm55_vm0 = vcmask 261120   ;;  %s1392_s0 = inlined_call_operand.vmem [shape: f32[8,8,32], index: 0, kind: input, shape index: {}]   ;;  %s1393_s1 = inlined_call_operand.vmem [shape: f32[8,32,24], index: 1, kind: input, shape index: {}]   ;;  %s1394_s2 = inlined_call_operand.vmem [shape: f32[8,8,32], index: 2, kind: input, shape index: {}]   ;;  %s1395_s3 = inlined_call_operand.hbm [shape: f32[2,8,32], index: 3, kind: output, shape index: {}]  }
   0x1   :  { %v26_v0 = vld [vmem:[%s1393_s1 + $0x18] sm:$0xff]  ;;  %v25_v3 = vld [vmem:[%s1393_s1 + $0x10] sm:$0xff]  ;;  %v24_v6 = vld [vmem:[%s1393_s1 + $0x8] sm:$0xff] }
   0x2   :  { %v34_v1 = vld [vmem:[%s1393_s1 + $0x58] sm:$0xff]  ;;  %71 = vmatpush.msra.mxu0 %v26_v0  ;;  %v33_v4 = vld [vmem:[%s1393_s1 + $0x50] sm:$0xff]  ;;  %v32_v7 = vld [vmem:[%s1393_s1 + $0x48] sm:$0xff] }
   0x3   :  { %v38_v2 = vld [vmem:[%s1393_s1 + $0x78] sm:$0xff]  ;;  %117 = vmatpush.msra.mxu2 %v34_v1  ;;  %v37_v5 = vld [vmem:[%s1393_s1 + $0x70] sm:$0xff]  ;;  %v36_v8 = vld [vmem:[%s1393_s1 + $0x68] sm:$0xff] }
   0x4   :  { %140 = vmatpush.msra.mxu3 %v38_v2  ;;  %72 = vmatpush.msra.mxu0 %v25_v3  ;;  %v23_v9 = vld [vmem:[%s1393_s1] sm:$0xff]  ;;  %v30_v13 = vld [vmem:[%s1393_s1 + $0x38] sm:$0xff]  ;;  %v17_v14 = vld [vmem:[%s1392_s0 + $0x10] sm:$0xff] }
   0x5   :  { %118 = vmatpush.msra.mxu2 %v33_v4  ;;  %v31_v10 = vld [vmem:[%s1393_s1 + $0x40] sm:$0xff]  ;;  %v18_v15 = vld [vmem:[%s1392_s0 + $0x18] sm:$0xff]  ;;  %94 = vmatpush.msra.mxu1 %v30_v13  ;;  %v29_v18 = vld [vmem:[%s1393_s1 + $0x30] sm:$0xff] }
   0x6   :  { %141 = vmatpush.msra.mxu3 %v37_v5  ;;  %73 = vmatpush.msra.mxu0 %v24_v6  ;;  %v35_v11 = vld [vmem:[%s1393_s1 + $0x60] sm:$0xff]  ;;  %v50_v16 = vld [vmem:[%s1393_s1 + $0xd8] sm:$0xff]  ;;  %v49_v19 = vld [vmem:[%s1393_s1 + $0xd0] sm:$0xff] }
   0x7   :  { %119 = vmatpush.msra.mxu2 %v32_v7  ;;  %v15_v12 = vld [vmem:[%s1392_s0] sm:$0xff]  ;;  %v54_v17 = vld [vmem:[%s1393_s1 + $0xf8] sm:$0xff]  ;;  %v53_v20 = vld [vmem:[%s1393_s1 + $0xf0] sm:$0xff]  ;;  %95 = vmatpush.msra.mxu1 %v29_v18 }
   0x8   :  { %142 = vmatpush.msra.mxu3 %v36_v8  ;;  %74 = vmatpush.msra.mxu0 %v23_v9  ;;  %v28_v21 = vld [vmem:[%s1393_s1 + $0x28] sm:$0xff]  ;;  %v42_v22 = vld [vmem:[%s1393_s1 + $0x98] sm:$0xff]  ;;  %v41_v23 = vld [vmem:[%s1393_s1 + $0x90] sm:$0xff] }
   0x9   :  { %120 = vmatpush.msra.mxu2 %v31_v10  ;;  %977 = vmatmul.msk.f32.vlgmr.msra.gmra.mxu0 %vm55_vm0, %v15_v12  ;;  %v48_v24 = vld [vmem:[%s1393_s1 + $0xc8] sm:$0xff]  ;;  %v27_v26 = vld [vmem:[%s1393_s1 + $0x20] sm:$0xff] }
   0xa   :  { %143 = vmatpush.msra.mxu3 %v35_v11  ;;  %979 = vmatmul.msk.f32.vlgmr.msra.gmra.mxu2 %vm55_vm0, %v17_v14  ;;  %v52_v25 = vld [vmem:[%s1393_s1 + $0xe8] sm:$0xff]  ;;  %v47_v28 = vld [vmem:[%s1393_s1 + $0xc0] sm:$0xff] }
   0xb   :  { %980 = vmatmul.msk.f32.vlgmr.msra.gmra.mxu3 %vm55_vm0, %v18_v15  ;;  %209 = vmatpush.msrb.mxu2 %v50_v16  ;;  %v40_v27 = vld [vmem:[%s1393_s1 + $0x88] sm:$0xff]  ;;  %v51_v29 = vld [vmem:[%s1393_s1 + $0xe0] sm:$0xff] }
   0xc   :  { %232 = vmatpush.msrb.mxu3 %v54_v17  ;;  %163 = vmatpush.msrb.mxu0 %v42_v22 }
   0xd   :  { %210 = vmatpush.msrb.mxu2 %v49_v19  ;;  %96 = vmatpush.msra.mxu1 %v28_v21 }
   0xe   :  { %233 = vmatpush.msrb.mxu3 %v53_v20  ;;  %164 = vmatpush.msrb.mxu0 %v41_v23 }
   0xf   :  { %8 = vsyncpa [#allocation3], 0  ;;  %211 = vmatpush.msrb.mxu2 %v48_v24  ;;  %v16_v30 = vld [vmem:[%s1392_s0 + $0x8] sm:$0xff]  ;;  %v21_v31 = vld [vmem:[%s1392_s0 + $0x30] sm:$0xff]  ;;  %97 = vmatpush.msra.mxu1 %v27_v26  ;;  %s1101_s11 = smov 120   ;;  %vm249_vm1 = vcmask 64512   ;;  %v240_v56 = vlaneseq }
  0x10   :  { %234 = vmatpush.msrb.mxu3 %v52_v25  ;;  %v22_v32 = vld [vmem:[%s1392_s0 + $0x38] sm:$0xff]  ;;  %165 = vmatpush.msrb.mxu0 %v40_v27  ;;  %v39_v33 = vld [vmem:[%s1393_s1 + $0x80] sm:$0xff]  ;;  %v45_v36 = vld [vmem:[%s1393_s1 + $0xb0] sm:$0xff]  ;;  %v1102_v59 = vmov 0.0   ;;  %s965_s30 = sshll.u32 %s1395_s3, 4  ;;  %s1105_s4 = smov 128   ;;  %s966_s30 = int_to_ptr.hbm [resolvable:$true] %s965_s30 }
  0x11   :  { %212 = vmatpush.msrb.mxu2 %v47_v28  ;;  %v46_v34 = vld [vmem:[%s1393_s1 + $0xb8] sm:$0xff]  ;;  %v19_v35 = vld [vmem:[%s1392_s0 + $0x20] sm:$0xff]  ;;  %978 = vmatmul.msk.f32.vlgmr.msra.gmra.mxu1 %vm55_vm0, %v16_v30  ;;  %v44_v37 = vld [vmem:[%s1393_s1 + $0xa8] sm:$0xff]  ;;  %v241_v57 = vshrl.u32 %v240_v56, 7  ;;  %v243_v58 = vand.u32 127, %v240_v56  ;;  %s1106_s5 = smov 8  }
  0x12   :  { %235 = vmatpush.msrb.mxu3 %v51_v29  ;;  %983 = vmatmul.msk.f32.vlgmr.msrb.gmra.mxu2 %vm55_vm0, %v21_v31  ;;  %v43_v38 = vld [vmem:[%s1393_s1 + $0xa0] sm:$0xff]  ;;  %v20_v39 = vld [vmem:[%s1392_s0 + $0x28] sm:$0xff]  ;;  %s1103_s0 = smov 112  }
  0x13   :  { %984 = vmatmul.msk.f32.vlgmr.msrb.gmra.mxu3 %vm55_vm0, %v22_v32  ;;  %166 = vmatpush.msrb.mxu0 %v39_v33  ;;  %vm244_vm2 = vcmp.gt.s32.totalorder %v243_v58, %v241_v57 }
  0x14   :  { %186 = vmatpush.msrb.mxu1 %v46_v34  ;;  %981 = vmatmul.msk.f32.vlgmr.msrb.gmra.mxu0 %vm55_vm0, %v19_v35  ;;  %v245_v60 = vsel %vm244_vm2, -1e+09, %v1102_v59 }
  0x16   :  { %187 = vmatpush.msrb.mxu1 %v45_v36 }
  0x18   :  { %188 = vmatpush.msrb.mxu1 %v44_v37 }
  0x1a   :  { %189 = vmatpush.msrb.mxu1 %v43_v38 }
  0x1b   :  { %982 = vmatmul.msk.f32.vlgmr.msrb.gmra.mxu1 %vm55_vm0, %v20_v39 }
  0x86   :  { %v1255_v40 = vpop.f32.mrf.mxu0 }
  0x87   :  { %247 = vrot.lane.b32.xlu2 %v1255_v40, %s1101_s11 }
  0x8d   :  { %v1258_v41 = vpop.f32.mrf.mxu2 }
  0x8e   :  { %302 = vrot.lane.b32.xlu0 %v1258_v41, %s1101_s11  ;;  %v1261_v42 = vpop.f32.mrf.mxu1  ;;  %v1264_v43 = vpop.f32.mrf.mxu3 }
  0x8f   :  { %275 = vrot.lane.b32.xlu2 %v1261_v42, %s1101_s11  ;;  %v1023_v21 = vpack.i.bf16 %v1264_v43, %v1258_v41 }
  0x91   :  { %v1270_v45 = vpop.f32.mrf.mxu0 }
  0x95   :  { %v1266_v44 = vpop.f32.mrf.mxu2 }
  0x96   :  { %329 = vrot.lane.b32.xlu0 %v1264_v43, %s1101_s11  ;;  %410 = vrot.lane.b32.xlu1 %v1266_v44, %s1101_s11  ;;  %v1272_v46 = vpop.f32.mrf.mxu3 }
  0x98   :  { %v1276_v47 = vpop.f32.mrf.mxu1 }
  0x9e   :  { %437 = vrot.lane.b32.xlu1 %v1272_v46, %s1101_s11  ;;  %356 = vrot.lane.b32.xlu0 %v1270_v45, %s1101_s11 }
  0xa6   :  { %383 = vrot.lane.b32.xlu1 %v1276_v47, %s1101_s11 }
  0xe1   :  { %v248_v48 = vpop.permute.xlu2 %247 }
  0xe2   :  { %985 = vmatpush.xpose.msk.msra.mxu0 %vm249_vm1, %v248_v48 }
  0xe5   :  { %986 = vmatmul.msk.f32.vlgmr.msra.gmra.mxu0 %vm249_vm1, %v1255_v40 }
  0xe9   :  { %v276_v49 = vpop.permute.xlu2 %275 }
  0xea   :  { %987 = vmatpush.xpose.msk.msra.mxu1 %vm249_vm1, %v276_v49 }
  0xed   :  { %988 = vmatmul.msk.f32.vlgmr.msra.gmra.mxu1 %vm249_vm1, %v1261_v42 }
 0x100   :  { %v303_v50 = vpop.permute.xlu0 %302 }
 0x101   :  { %989 = vmatpush.xpose.msk.msra.mxu2 %vm249_vm1, %v303_v50 }
 0x104   :  { %990 = vmatmul.msk.f32.vlgmr.msra.gmra.mxu2 %vm249_vm1, %v1258_v41 }
 0x108   :  { %v330_v51 = vpop.permute.xlu0 %329  ;;  %v411_v52 = vpop.permute.xlu1 %410 }
 0x109   :  { %991 = vmatpush.xpose.msk.msra.mxu3 %vm249_vm1, %v330_v51  ;;  %997 = vmatpush.xpose.msk.msrb.mxu2 %vm249_vm1, %v411_v52 }
 0x10c   :  { %992 = vmatmul.msk.f32.vlgmr.msra.gmra.mxu3 %vm249_vm1, %v1264_v43  ;;  %998 = vmatmul.msk.f32.vlgmr.msrb.gmra.mxu2 %vm249_vm1, %v1266_v44 }
 0x110   :  { %v438_v53 = vpop.permute.xlu1 %437  ;;  %v357_v54 = vpop.permute.xlu0 %356 }
 0x111   :  { %993 = vmatpush.xpose.msk.msrb.mxu0 %vm249_vm1, %v357_v54  ;;  %999 = vmatpush.xpose.msk.msrb.mxu3 %vm249_vm1, %v438_v53 }
 0x114   :  { %994 = vmatmul.msk.f32.vlgmr.msrb.gmra.mxu0 %vm249_vm1, %v1270_v45  ;;  %1000 = vmatmul.msk.f32.vlgmr.msrb.gmra.mxu3 %vm249_vm1, %v1272_v46 }
 0x118   :  { %v384_v55 = vpop.permute.xlu1 %383 }
 0x119   :  { %995 = vmatpush.xpose.msk.msrb.mxu1 %vm249_vm1, %v384_v55 }
 0x11c   :  { %996 = vmatmul.msk.f32.vlgmr.msrb.gmra.mxu1 %vm249_vm1, %v1276_v47 }
 0x162   :  { %v271_v61 = vpop.f32.mrf.mxu0 }
 0x163   :  { %v272_v62 = vadd.f32 %v271_v61, %v245_v60 }
 0x165   :  { %v463_v63 = vsel %vm249_vm1, %v272_v62, -inf }
 0x166   :  { %464 = vmax.xlane.f32.xlu2 %v463_v63 }
 0x16a   :  { %v298_v0 = vpop.f32.mrf.mxu1 }
 0x16b   :  { %v299_v1 = vadd.f32 %v298_v0, %v245_v60 }
 0x16d   :  { %v466_v2 = vsel %vm249_vm1, %v299_v1, -inf }
 0x16e   :  { %467 = vmax.xlane.f32.xlu0 %v466_v2 }
 0x187   :  { %v325_v3 = vpop.f32.mrf.mxu2 }
 0x188   :  { %v326_v4 = vadd.f32 %v325_v3, %v245_v60 }
 0x18a   :  { %v469_v5 = vsel %vm249_vm1, %v326_v4, -inf }
 0x18b   :  { %470 = vmax.xlane.f32.xlu2 %v469_v5 }
 0x18f   :  { %v352_v6 = vpop.f32.mrf.mxu3  ;;  %v433_v12 = vpop.f32.mrf.mxu2 }
 0x190   :  { %v353_v7 = vadd.f32 %v352_v6, %v245_v60  ;;  %v434_v14 = vadd.f32 %v433_v12, %v245_v60  ;;  %v1033_v6 = vpack.i.bf16 %v1261_v42, %v1255_v40 }
 0x191   :  { %v379_v8 = vpop.f32.mrf.mxu0 }
 0x192   :  { %v380_v9 = vadd.f32 %v379_v8, %v245_v60  ;;  %v472_v10 = vsel %vm249_vm1, %v353_v7, -inf  ;;  %v481_v18 = vsel %vm249_vm1, %v434_v14, -inf  ;;  %v1028_v8 = vpack.i.bf16 %v1272_v46, %v1266_v44 }
 0x193   :  { %473 = vmax.xlane.f32.xlu0 %v472_v10 }
 0x194   :  { %v475_v11 = vsel %vm249_vm1, %v380_v9, -inf }
 0x195   :  { %476 = vmax.xlane.f32.xlu1 %v475_v11 }
 0x197   :  { %v460_v13 = vpop.f32.mrf.mxu3 }
 0x198   :  { %v461_v15 = vadd.f32 %v460_v13, %v245_v60 }
 0x199   :  { %v406_v17 = vpop.f32.mrf.mxu1 }
 0x19a   :  { %v484_v16 = vsel %vm249_vm1, %v461_v15, -inf  ;;  %v407_v19 = vadd.f32 %v406_v17, %v245_v60 }
 0x19b   :  { %485 = vmax.xlane.f32.xlu2 %v484_v16 }
 0x19c   :  { %v478_v20 = vsel %vm249_vm1, %v407_v19, -inf }
 0x19d   :  { %482 = vmax.xlane.f32.xlu1 %v481_v18 }
 0x1a3   :  { %479 = vmax.xlane.f32.xlu2 %v478_v20 }
 0x1b6   :  { %1024 = vrot.lane.b32.xlu1 %v1023_v21, %s1103_s0 }
 0x1d9   :  { %v465_v22 = vpop.xlane.xlu2 %464 }
 0x1da   :  { %v487_v23 = vsub.f32 %v272_v62, %v465_v22 }
 0x1dc   :  { %v495_v24 = vmul.f32 1.442695, %v487_v23 }
 0x1de   :  { %1043 = vpow2.f32 %v495_v24 }
 0x1e1   :  { %v468_v25 = vpop.xlane.xlu0 %467 }
 0x1e2   :  { %v488_v26 = vsub.f32 %v299_v1, %v468_v25 }
 0x1e4   :  { %v1314_v27 = vpop.eup %1043  ;;  %v497_v28 = vmul.f32 1.442695, %v488_v26 }
 0x1e5   :  { %v511_v29 = vsel %vm249_vm1, %v1314_v27, 0.0 }
 0x1e6   :  { %512 = vadd.xlane.f32.xlu2 %v511_v29  ;;  %1045 = vpow2.f32 %v497_v28 }
 0x1ec   :  { %v1318_v30 = vpop.eup %1045 }
 0x1ed   :  { %v514_v31 = vsel %vm249_vm1, %v1318_v30, 0.0 }
 0x1ee   :  { %515 = vadd.xlane.f32.xlu0 %v514_v31 }
 0x1fe   :  { %v471_v32 = vpop.xlane.xlu2 %470 }
 0x1ff   :  { %v489_v33 = vsub.f32 %v326_v4, %v471_v32 }
 0x201   :  { %v499_v34 = vmul.f32 1.442695, %v489_v33 }
 0x203   :  { %1047 = vpow2.f32 %v499_v34 }
 0x206   :  { %v474_v35 = vpop.xlane.xlu0 %473 }
 0x207   :  { %v490_v36 = vsub.f32 %v353_v7, %v474_v35 }
 0x208   :  { %v477_v37 = vpop.xlane.xlu1 %476 }
 0x209   :  { %v1048_v38 = vpop.eup %1047  ;;  %v501_v39 = vmul.f32 1.442695, %v490_v36  ;;  %v491_v41 = vsub.f32 %v380_v9, %v477_v37  ;;  %v1038_v9 = vpack.i.bf16 %v1276_v47, %v1270_v45  ;;  %v761_v37 = vld [vmem:[%s1394_s2 + $0x10] sm:$0xff] }
 0x20a   :  { %v517_v43 = vsel %vm249_vm1, %v1048_v38, 0.0 }
 0x20b   :  { %1049 = vpow2.f32 %v501_v39  ;;  %v503_v48 = vmul.f32 1.442695, %v491_v41  ;;  %518 = vadd.xlane.f32.xlu0 %v517_v43  ;;  %v759_v39 = vld [vmem:[%s1394_s2] sm:$0xff]  ;;  %v760_v41 = vld [vmem:[%s1394_s2 + $0x8] sm:$0xff]  ;;  %v765_v43 = vld [vmem:[%s1394_s2 + $0x30] sm:$0xff] }
 0x20d   :  { %1051 = vpow2.f32 %v503_v48 }
 0x20e   :  { %v486_v49 = vpop.xlane.xlu2 %485 }
 0x20f   :  { %v494_v60 = vsub.f32 %v461_v15, %v486_v49  ;;  %v766_v49 = vld [vmem:[%s1394_s2 + $0x38] sm:$0xff] }
 0x210   :  { %v483_v50 = vpop.xlane.xlu1 %482 }
 0x211   :  { %v1050_v51 = vpop.eup %1049  ;;  %v493_v52 = vsub.f32 %v434_v14, %v483_v50  ;;  %v509_v63 = vmul.f32 1.442695, %v494_v60  ;;  %v763_v50 = vld [vmem:[%s1394_s2 + $0x20] sm:$0xff] }
 0x212   :  { %v520_v53 = vsel %vm249_vm1, %v1050_v51, 0.0 }
 0x213   :  { %v1324_v54 = vpop.eup %1051  ;;  %v507_v55 = vmul.f32 1.442695, %v493_v52  ;;  %521 = vadd.xlane.f32.xlu1 %v520_v53 }
 0x214   :  { %v523_v56 = vsel %vm249_vm1, %v1324_v54, 0.0 }
 0x215   :  { %1053 = vpow2.f32 %v507_v55  ;;  %524 = vadd.xlane.f32.xlu0 %v523_v56 }
 0x216   :  { %v480_v57 = vpop.xlane.xlu2 %479 }
 0x217   :  { %v492_v58 = vsub.f32 %v407_v19, %v480_v57 }
 0x219   :  { %v505_v59 = vmul.f32 1.442695, %v492_v58 }
 0x21b   :  { %v1054_v61 = vpop.eup %1053  ;;  %1055 = vpow2.f32 %v505_v59 }
 0x21c   :  { %v529_v62 = vsel %vm249_vm1, %v1054_v61, 0.0  ;;  %1057 = vpow2.f32 %v509_v63 }
 0x21d   :  { %530 = vadd.xlane.f32.xlu2 %v529_v62 }
 0x221   :  { %v1329_v0 = vpop.eup %1055 }
 0x222   :  { %v526_v1 = vsel %vm249_vm1, %v1329_v0, 0.0  ;;  %v1058_v2 = vpop.eup %1057 }
 0x223   :  { %527 = vadd.xlane.f32.xlu0 %v526_v1  ;;  %v532_v7 = vsel %vm249_vm1, %v1058_v2, 0.0 }
 0x228   :  { %v1025_v3 = vpop.permute.xlu1 %1024 }
 0x229   :  { %v1027_v4 = vunpack.i.h.bf16 %v1025_v3  ;;  %v1026_v5 = vunpack.i.l.bf16 %v1025_v3 }
 0x22b   :  { %624 = vmatpush.msra.mxu2 %v1026_v5  ;;  %650 = vmatpush.msra.mxu3 %v1027_v4 }
 0x22c   :  { %533 = vadd.xlane.f32.xlu0 %v532_v7  ;;  %1034 = vrot.lane.b32.xlu1 %v1033_v6, %s1103_s0 }
 0x235   :  { %1029 = vrot.lane.b32.xlu2 %v1028_v8, %s1103_s0 }
 0x240   :  { %1039 = vrot.lane.b32.xlu0 %v1038_v9, %s1103_s0 }
 0x259   :  { %v513_v13 = vpop.xlane.xlu2 %512 }
 0x261   :  { %v516_v10 = vpop.xlane.xlu0 %515 }
 0x27e   :  { %v519_v11 = vpop.xlane.xlu0 %518 }
 0x27f   :  { %1059 = vrcp.f32 %v519_v11 }
 0x285   :  { %v1060_v40 = vpop.eup %1059 }
 0x286   :  { %v545_v42 = vmul.f32 %v1060_v40, %v1048_v38  ;;  %v522_v12 = vpop.xlane.xlu1 %521  ;;  %v762_v38 = vld [vmem:[%s1394_s2 + $0x18] sm:$0xff] }
 0x287   :  { %1061 = vrcp.f32 %v522_v12 }
 0x288   :  { %1003 = vmatmul.msk.f32.vlgmr.msra.gmra.mxu2 %vm249_vm1, %v545_v42  ;;  %v525_v44 = vpop.xlane.xlu0 %524 }
 0x28d   :  { %v1062_v14 = vpop.eup %1061 }
 0x28e   :  { %v546_v15 = vmul.f32 %v1062_v14, %v1050_v51  ;;  %v764_v51 = vld [vmem:[%s1394_s2 + $0x28] sm:$0xff]  ;;  %s1104_s2 = smov [#allocation2]  }
 0x28f   :  { %s963_s27 = sshll.u32 %s1104_s2, 4  ;;  %s964_s27 = int_to_ptr.vmem [resolvable:$true] %s963_s27 }
 0x290   :  { %1004 = vmatmul.msk.f32.vlgmr.msra.gmra.mxu3 %vm249_vm1, %v546_v15  ;;  %v531_v46 = vpop.xlane.xlu2 %530 }
 0x291   :  { %1063 = vrcp.f32 %v531_v46 }
 0x292   :  { %1065 = vrcp.f32 %v513_v13 }
 0x293   :  { %1067 = vrcp.f32 %v516_v10 }
 0x296   :  { %v528_v45 = vpop.xlane.xlu0 %527 }
 0x297   :  { %v1064_v47 = vpop.eup %1063 }
 0x298   :  { %v1030_v16 = vpop.permute.xlu2 %1029  ;;  %v549_v19 = vmul.f32 %v1064_v47, %v1054_v61  ;;  %v1066_v20 = vpop.eup %1065 }
 0x299   :  { %v1032_v17 = vunpack.i.h.bf16 %v1030_v16  ;;  %v1031_v18 = vunpack.i.l.bf16 %v1030_v16  ;;  %v1068_v21 = vpop.eup %1067  ;;  %v543_v26 = vmul.f32 %v1066_v20, %v1314_v27 }
 0x29a   :  { %v544_v28 = vmul.f32 %v1068_v21, %v1318_v30 }
 0x29b   :  { %728 = vmatpush.msrb.mxu2 %v1031_v18  ;;  %754 = vmatpush.msrb.mxu3 %v1032_v17 }
 0x29c   :  { %1007 = vmatmul.msk.f32.vlgmr.msrb.gmra.mxu2 %vm249_vm1, %v549_v19 }
 0x29d   :  { %831 = vmatpush.msra.mxu2 %v761_v37  ;;  %854 = vmatpush.msra.mxu3 %v762_v38 }
 0x29e   :  { %v1035_v22 = vpop.permute.xlu1 %1034 }
 0x29f   :  { %v1037_v23 = vunpack.i.h.bf16 %v1035_v22  ;;  %v1036_v24 = vunpack.i.l.bf16 %v1035_v22  ;;  %v534_v25 = vpop.xlane.xlu0 %533  ;;  %923 = vmatpush.msrb.mxu2 %v765_v43 }
 0x2a0   :  { %1069 = vrcp.f32 %v534_v25 }
 0x2a1   :  { %572 = vmatpush.msra.mxu0 %v1036_v24  ;;  %598 = vmatpush.msra.mxu1 %v1037_v23  ;;  %1071 = vrcp.f32 %v525_v44 }
 0x2a2   :  { %1001 = vmatmul.msk.f32.vlgmr.msra.gmra.mxu0 %vm249_vm1, %v543_v26  ;;  %1002 = vmatmul.msk.f32.vlgmr.msra.gmra.mxu1 %vm249_vm1, %v544_v28  ;;  %1073 = vrcp.f32 %v528_v45 }
 0x2a6   :  { %v1070_v29 = vpop.eup %1069 }
 0x2a7   :  { %v550_v31 = vmul.f32 %v1070_v29, %v1058_v2  ;;  %v1072_v32 = vpop.eup %1071 }
 0x2a8   :  { %v1074_v33 = vpop.eup %1073  ;;  %v547_v30 = vmul.f32 %v1072_v32, %v1324_v54 }
 0x2a9   :  { %1008 = vmatmul.msk.f32.vlgmr.msrb.gmra.mxu3 %vm249_vm1, %v550_v31  ;;  %v548_v36 = vmul.f32 %v1074_v33, %v1329_v0 }
 0x2aa   :  { %946 = vmatpush.msrb.mxu3 %v766_v49 }
 0x2b2   :  { %v1040_v34 = vpop.permute.xlu0 %1039 }
 0x2b3   :  { %v1042_v35 = vunpack.i.h.bf16 %v1040_v34  ;;  %v1041_v27 = vunpack.i.l.bf16 %v1040_v34 }
 0x2b5   :  { %676 = vmatpush.msrb.mxu0 %v1041_v27  ;;  %702 = vmatpush.msrb.mxu1 %v1042_v35 }
 0x2b6   :  { %1005 = vmatmul.msk.f32.vlgmr.msrb.gmra.mxu0 %vm249_vm1, %v547_v30  ;;  %1006 = vmatmul.msk.f32.vlgmr.msrb.gmra.mxu1 %vm249_vm1, %v548_v36 }
 0x2b7   :  { %785 = vmatpush.msra.mxu0 %v759_v39  ;;  %808 = vmatpush.msra.mxu1 %v760_v41 }
 0x2b9   :  { %877 = vmatpush.msrb.mxu0 %v763_v50  ;;  %900 = vmatpush.msrb.mxu1 %v764_v51 }
 0x30b   :  { %v626_v48 = vpop.f32.mrf.mxu2 }
 0x30c   :  { %1011 = vmatmul.msk.f32.vlgmr.msra.gmra.mxu2 %vm249_vm1, %v626_v48 }
 0x313   :  { %v652_v52 = vpop.f32.mrf.mxu3 }
 0x314   :  { %1012 = vmatmul.msk.f32.vlgmr.msra.gmra.mxu3 %vm249_vm1, %v652_v52 }
 0x31f   :  { %v574_v53 = vpop.f32.mrf.mxu0  ;;  %v600_v54 = vpop.f32.mrf.mxu1 }
 0x320   :  { %v730_v55 = vpop.f32.mrf.mxu2  ;;  %1009 = vmatmul.msk.f32.vlgmr.msra.gmra.mxu0 %vm249_vm1, %v574_v53  ;;  %1010 = vmatmul.msk.f32.vlgmr.msra.gmra.mxu1 %vm249_vm1, %v600_v54 }
 0x321   :  { %1015 = vmatmul.msk.f32.vlgmr.msrb.gmra.mxu2 %vm249_vm1, %v730_v55 }
 0x32c   :  { %v756_v56 = vpop.f32.mrf.mxu3 }
 0x32d   :  { %1016 = vmatmul.msk.f32.vlgmr.msrb.gmra.mxu3 %vm249_vm1, %v756_v56 }
 0x333   :  { %v678_v57 = vpop.f32.mrf.mxu0  ;;  %v704_v58 = vpop.f32.mrf.mxu1 }
 0x334   :  { %1013 = vmatmul.msk.f32.vlgmr.msrb.gmra.mxu0 %vm249_vm1, %v678_v57  ;;  %1014 = vmatmul.msk.f32.vlgmr.msrb.gmra.mxu1 %vm249_vm1, %v704_v58 }
 0x38f   :  { %v833_v61 = vpop.f32.mrf.mxu2 }
 0x397   :  { %v856_v62 = vpop.f32.mrf.mxu3 }
 0x39d   :  { %v787_v59 = vpop.f32.mrf.mxu0  ;;  %v810_v60 = vpop.f32.mrf.mxu1 }
 0x39e   :  { %v951_v63 = vadd.f32 %v833_v61, %v787_v59  ;;  %v952_v0 = vadd.f32 %v856_v62, %v810_v60 }
 0x3a4   :  { %v925_v5 = vpop.f32.mrf.mxu2 }
 0x3b0   :  { %v948_v6 = vpop.f32.mrf.mxu3 }
 0x3b1   :  { %v879_v1 = vpop.f32.mrf.mxu0  ;;  %v902_v2 = vpop.f32.mrf.mxu1 }
 0x3b2   :  { %v953_v3 = vadd.f32 %v951_v63, %v879_v1  ;;  %v954_v4 = vadd.f32 %v952_v0, %v902_v2 }
 0x3b4   :  { %v955_v7 = vadd.f32 %v953_v3, %v925_v5  ;;  %v956_v8 = vadd.f32 %v954_v4, %v948_v6 }
 0x3b6   :  { %957 = vst.msk [vmem:[#allocation2] sm:$0xff] %vm55_vm0, %v955_v7 }
 0x3b7   :  { %958 = vst.msk [vmem:[#allocation2 + $0x8] sm:$0xff] %vm55_vm0, %v956_v8 }
 0x3b8   :  { %971 = dma.vmem_to_hbm [thread:$0]  %s964_s27, 256, %s966_s30, [#allocation3], %s1105_s4, %s1105_s4, %s1106_s5  }
 0x3b9   :  { %1099 = dma.done.wait [#allocation3], 256  }
 0x3ba   :  { %1100 = vsyncadd [#allocation3], 4294967040 }
 0x3bb   :  { %976 = vsyncpa [#allocation3], 1 }

</bundles_post_ra>
